<compile_context>
chip_gen: v6e
topology: v6e:2x2x1
jax: 0.10.0
libtpu: 0.0.40
codegen_flags: <defaults>
</compile_context>

<pallas_src>
import functools

import jax
import jax.numpy as jnp
from jax import lax
from jax.experimental import pallas as pl
from jax.experimental.pallas import tpu as pltpu

EPS = 1e-5  # nn.InstanceNorm2d default


def _vmem_limit_bytes(default=48 * 1024 * 1024):
    """Use most of the part's VMEM (~96 MiB on 128-MiB parts, ~48 MiB on v7x)."""
    try:
        cap = int(getattr(pltpu.get_tpu_info(), "vmem_capacity_bytes", 0))
    except Exception:
        cap = 0
    if cap <= 0:
        return default
    return max(default, min(cap * 3 // 4, 112 * 1024 * 1024))


def _pick_row_tile(h_half, w_half, max_rows):
    """Largest divisor of h_half whose flattened row count stays <= max_rows."""
    for tr in range(h_half, 0, -1):
        if h_half % tr == 0 and tr * w_half <= max_rows:
            return tr
    return 1


def _block_kernel(x_ref, w_ref, g_ref, b_ref, out_ref,
                  acc_ref, sum_ref, ssq_ref, *,
                  hw, tr, w_half, rows_per_tile, n_h):
    # x_ref  : (1, 1, TR+1, W/2+1, 4*C_in) bf16  space-to-depth rows (+1 halo row)
    # w_ref  : (4, 4*C_in, CT)             bf16  conv weights (resident)
    # g_ref  : (1, CT) f32   instance-norm gamma (zero-padded channels)
    # b_ref  : (1, CT) f32   instance-norm beta
    # out_ref: (1, HW, CT)   bf16  resident across the h axis
    # acc_ref: (rows_per_tile, CT) f32  per-tile conv accumulator
    # sum_ref/ssq_ref: (1, CT) f32 running per-channel stats
    h = pl.program_id(2)

    @pl.when(h == 0)
    def _init_stats():
        sum_ref[...] = jnp.zeros_like(sum_ref)
        ssq_ref[...] = jnp.zeros_like(ssq_ref)

    # ---- conv tile: 4 shifted matmuls (a, b) in {0,1}^2, f32 accumulation ----
    for a in (0, 1):
        for b in (0, 1):
            op = x_ref[0, 0, a:a + tr, b:b + w_half, :]
            op = op.reshape(rows_per_tile, op.shape[-1])
            contrib = jnp.dot(op, w_ref[2 * a + b],
                              preferred_element_type=jnp.float32)
            if a == 0 and b == 0:
                acc_ref[...] = contrib
            else:
                acc_ref[...] += contrib

    y = acc_ref[...]                                      # (rows, CT) f32
    sum_ref[...] += jnp.sum(y, axis=0, keepdims=True)
    ssq_ref[...] += jnp.sum(y * y, axis=0, keepdims=True)

    row0 = h * rows_per_tile
    if rows_per_tile % 8 == 0:
        row0 = pl.multiple_of(row0, 8)
    out_ref[0, pl.ds(row0, rows_per_tile), :] = y.astype(out_ref.dtype)

    @pl.when(h == n_h - 1)
    def _finalize():
        ct = sum_ref.shape[-1]
        inv_hw = jnp.float32(1.0 / hw)
        mean = sum_ref[...] * inv_hw                      # (1, CT)
        var = jnp.maximum(ssq_ref[...] * inv_hw - mean * mean, 0.0)
        scale = g_ref[...] * lax.rsqrt(var + EPS)
        shift = b_ref[...] - mean * scale
        # Hoist the (1, CT) -> (rows, CT) broadcasts out of the row loop.
        scale_b = jnp.broadcast_to(scale, (rows_per_tile, ct))
        shift_b = jnp.broadcast_to(shift, (rows_per_tile, ct))

        def body(i, carry):
            r = i * rows_per_tile
            if rows_per_tile % 8 == 0:
                r = pl.multiple_of(r, 8)
            blk = out_ref[0, pl.ds(r, rows_per_tile), :].astype(jnp.float32)
            out_ref[0, pl.ds(r, rows_per_tile), :] = jnp.maximum(
                blk * scale_b + shift_b, 0.0).astype(out_ref.dtype)
            return carry

        lax.fori_loop(0, n_h, body, 0, unroll=n_h <= 4)


@jax.jit
def block_forward(x, conv_w, gamma, beta):
    """Block forward (down=True, relu, no dropout).

    x: (N, C_in, H, W) f32; conv_w: (C_out, C_in, 4, 4); gamma/beta: (C_out,).
    Returns (N, C_out, H//2, W//2) f32.
    """
    N, C_in, H, W = x.shape
    C_out = conv_w.shape[0]
    assert H % 2 == 0 and W % 2 == 0, "spatial dims must be even for stride 2"
    h_half, w_half = H // 2, W // 2
    hp, wp = h_half + 1, w_half + 1
    c4 = 4 * C_in
    hw = h_half * w_half

    vmem_limit = _vmem_limit_bytes()
    max_rows = 2048 if vmem_limit >= 90 * 1024 * 1024 else 1024
    tr = _pick_row_tile(h_half, w_half, max_rows)
    n_h = h_half // tr
    rows_per_tile = tr * w_half

    # -- space-to-depth of the reflect-padded input (1x data; no im2col blowup) --
    # X[n, i, j, c*4 + p*2 + q] = x_pad[n, c, 2i+p, 2j+q]
    xp = jnp.pad(x, ((0, 0), (0, 0), (1, 1), (1, 1)), mode="reflect")
    xr = xp.reshape(N, C_in, hp, 2, wp, 2)                        # [n,c,i,p,j,q]
    x_cat = jnp.transpose(xr, (0, 2, 4, 1, 3, 5)).reshape(N, hp, wp, c4)
    x_cat = x_cat.astype(jnp.bfloat16)
    # Row tiles with a 1-row halo so each grid step is self-contained.
    row_idx = jnp.arange(n_h)[:, None] * tr + jnp.arange(tr + 1)[None, :]
    x_tiles = jnp.take(x_cat, row_idx, axis=1)                    # (N,n_h,tr+1,wp,c4)

    # -- weights for the 4 (a,b) offsets; lane-dense zero-padded C_out; resident --
    # W_all[2a+b, c*4+2p+q, o] = conv_w[o, c, 2a+p, 2b+q]
    C_pad = max(128, -(-C_out // 128) * 128)
    ct = min(C_pad, 256)
    n_c = C_pad // ct
    wr = conv_w.reshape(C_out, C_in, 2, 2, 2, 2)                  # [o,c,a,p,b,q]
    w_all = jnp.transpose(wr, (2, 4, 1, 3, 5, 0)).reshape(4, c4, C_out)
    w_all = jnp.pad(w_all, ((0, 0), (0, 0), (0, C_pad - C_out))).astype(jnp.bfloat16)
    gamma_p = jnp.pad(gamma.astype(jnp.float32), (0, C_pad - C_out)).reshape(1, C_pad)
    beta_p = jnp.pad(beta.astype(jnp.float32), (0, C_pad - C_out)).reshape(1, C_pad)

    kernel = functools.partial(_block_kernel, hw=hw, tr=tr, w_half=w_half,
                               rows_per_tile=rows_per_tile, n_h=n_h)

    out = pl.pallas_call(
        kernel,
        out_shape=jax.ShapeDtypeStruct((N, hw, C_pad), jnp.bfloat16),
        grid_spec=pltpu.PrefetchScalarGridSpec(
            num_scalar_prefetch=0,
            grid=(N, n_c, n_h),
            in_specs=[
                pl.BlockSpec((1, 1, tr + 1, wp, c4),
                             lambda n, c, h: (n, h, 0, 0, 0)),
                pl.BlockSpec((4, c4, ct), lambda n, c, h: (0, 0, c)),
                pl.BlockSpec((1, ct), lambda n, c, h: (0, c)),
                pl.BlockSpec((1, ct), lambda n, c, h: (0, c)),
            ],
            out_specs=pl.BlockSpec((1, hw, ct), lambda n, c, h: (n, 0, c)),
            scratch_shapes=[
                pltpu.VMEM((rows_per_tile, ct), jnp.float32),   # conv accumulator
                pltpu.VMEM((1, ct), jnp.float32),               # per-channel sum
                pltpu.VMEM((1, ct), jnp.float32),               # per-channel sum sq
            ],
        ),
        compiler_params=pltpu.CompilerParams(
            dimension_semantics=("parallel", "parallel", "arbitrary"),
            vmem_limit_bytes=vmem_limit,
        ),
    )(x_tiles, w_all, gamma_p, beta_p)

    out = out[:, :, :C_out]                                       # drop channel pad
    out = out.reshape(N, h_half, w_half, C_out).transpose(0, 3, 1, 2)
    return out.astype(jnp.float32)


def _reference(x, conv_w, gamma, beta):
    """Pure-JAX reference of the PyTorch Block forward (down=True, relu, no dropout)."""
    xp = jnp.pad(x, ((0, 0), (0, 0), (1, 1), (1, 1)), mode="reflect")
    y = lax.conv_general_dilated(
        xp, conv_w, window_strides=(2, 2), padding="VALID",
        dimension_numbers=("NCHW", "OIHW", "NCHW"))
    mean = jnp.mean(y, axis=(2, 3), keepdims=True)
    var = jnp.mean((y - mean) ** 2, axis=(2, 3), keepdims=True)
    y = (y - mean) / jnp.sqrt(var + EPS)
    y = y * gamma.reshape(1, -1, 1, 1) + beta.reshape(1, -1, 1, 1)
    return jnp.maximum(y, 0.0)


if __name__ == "__main__":
    key = jax.random.PRNGKey(0)
    k_x, k_w, k_g, k_b = jax.random.split(key, 4)

    N, C_in, H, W = 2, 4, 16, 16
    C_out = 8

    x = jax.random.normal(k_x, (N, C_in, H, W), dtype=jnp.float32)
    conv_w = jax.random.normal(k_w, (C_out, C_in, 4, 4), dtype=jnp.float32) * 0.1
    gamma = 1.0 + 0.1 * jax.random.normal(k_g, (C_out,), dtype=jnp.float32)
    beta = 0.1 * jax.random.normal(k_b, (C_out,), dtype=jnp.float32)

    out = block_forward(x, conv_w, gamma, beta)
    out = jax.block_until_ready(out)

    # Reference on bf16-rounded conv inputs (the kernel feeds the MXU in bf16 and
    # parks / emits activations in bf16, hence the slightly looser tolerance).
    xb = x.astype(jnp.bfloat16).astype(jnp.float32)
    wb = conv_w.astype(jnp.bfloat16).astype(jnp.float32)
    ref = _reference(xb, wb, gamma, beta)

    assert out.shape == (N, C_out, H // 2, W // 2), out.shape
    err = float(jnp.max(jnp.abs(out - ref)))
    assert jnp.allclose(out, ref, atol=5e-2, rtol=5e-2), err

    print("KERNEL_OK")
</pallas_src>

<mosaic_0001>
module attributes {stable_mosaic.version = 11 : i64} {
  func.func @_block_kernel(%arg0: i32, %arg1: i32, %arg2: i32, %arg3: memref<1x1x9x9x16xbf16, #tpu.memory_space<vmem>>, %arg4: memref<4x16x128xbf16, #tpu.memory_space<vmem>>, %arg5: memref<1x128xf32, #tpu.memory_space<vmem>>, %arg6: memref<1x128xf32, #tpu.memory_space<vmem>>, %arg7: memref<1x64x128xbf16, #tpu.memory_space<vmem>>, %arg8: memref<64x128xf32, #tpu.memory_space<vmem>>, %arg9: memref<1x128xf32, #tpu.memory_space<vmem>>, %arg10: memref<1x128xf32, #tpu.memory_space<vmem>>) attributes {dimension_semantics = [#tpu.dimension_semantics<parallel>, #tpu.dimension_semantics<parallel>, #tpu.dimension_semantics<arbitrary>], iteration_bounds = array<i64: 2, 1, 1>, scalar_prefetch = 0 : i64, scratch_operands = 3 : i64, tpu.core_type = #tpu.core_type<tc>, window_params = [{transform_indices = @transform_0, window_bounds = array<i64: 1, 1, 9, 9, 16>}, {transform_indices = @transform_1, window_bounds = array<i64: 4, 16, 128>}, {transform_indices = @transform_2, window_bounds = array<i64: 1, 128>}, {transform_indices = @transform_3, window_bounds = array<i64: 1, 128>}, {transform_indices = @transform_4, window_bounds = array<i64: 1, 64, 128>}]} {
    %c0_i32 = arith.constant 0 : i32
    %0 = arith.cmpi eq, %arg2, %c0_i32 : i32
    %1 = arith.extui %0 : i1 to i32
    %c0_i32_0 = arith.constant 0 : i32
    %2 = arith.cmpi ne, %1, %c0_i32_0 : i32
    scf.if %2 {
      %cst_62 = arith.constant 0.000000e+00 : f32
      %59 = vector.broadcast %cst_62 : f32 to vector<1x128xf32>
      %c0_63 = arith.constant 0 : index
      %c0_64 = arith.constant 0 : index
      %60 = vector.load %arg9[%c0_63, %c0_64] : memref<1x128xf32, #tpu.memory_space<vmem>>, vector<1x128xf32>
      tpu.vector_store %arg9[%c0_63, %c0_64], %59 {strides = array<i32>} : memref<1x128xf32, #tpu.memory_space<vmem>>, vector<1x128xf32>,
      %cst_65 = arith.constant 0.000000e+00 : f32
      %61 = vector.broadcast %cst_65 : f32 to vector<1x128xf32>
      %c0_66 = arith.constant 0 : index
      %c0_67 = arith.constant 0 : index
      %62 = vector.load %arg10[%c0_66, %c0_67] : memref<1x128xf32, #tpu.memory_space<vmem>>, vector<1x128xf32>
      tpu.vector_store %arg10[%c0_66, %c0_67], %61 {strides = array<i32>} : memref<1x128xf32, #tpu.memory_space<vmem>>, vector<1x128xf32>,
    } else {
    }
    %c0 = arith.constant 0 : index
    %c0_1 = arith.constant 0 : index
    %c0_2 = arith.constant 0 : index
    %c0_3 = arith.constant 0 : index
    %c0_4 = arith.constant 0 : index
    %3 = vector.load %arg3[%c0, %c0_1, %c0_2, %c0_3, %c0_4] : memref<1x1x9x9x16xbf16, #tpu.memory_space<vmem>>, vector<1x1x8x8x16xbf16>
    %4 = vector.shape_cast %3 : vector<1x1x8x8x16xbf16> to vector<8x8x16xbf16>
    %5 = vector.shape_cast %4 : vector<8x8x16xbf16> to vector<64x16xbf16>
    %c0_5 = arith.constant 0 : index
    %c0_6 = arith.constant 0 : index
    %c0_7 = arith.constant 0 : index
    %6 = vector.load %arg4[%c0_5, %c0_6, %c0_7] : memref<4x16x128xbf16, #tpu.memory_space<vmem>>, vector<1x16x128xbf16>
    %7 = vector.shape_cast %6 : vector<1x16x128xbf16> to vector<16x128xbf16>
    %cst = arith.constant dense<0.000000e+00> : vector<64x128xf32>
    %8 = tpu.matmul %5, %7, %cst {dimension_numbers = #tpu.dot_dimension_numbers<[1], [0], [0], [1], [0, 0, 1, 1], [], []>} : vector<64x16xbf16>, vector<16x128xbf16>, vector<64x128xf32> -> vector<64x128xf32>
    %c0_8 = arith.constant 0 : index
    %c0_9 = arith.constant 0 : index
    %9 = vector.load %arg8[%c0_8, %c0_9] : memref<64x128xf32, #tpu.memory_space<vmem>>, vector<64x128xf32>
    tpu.vector_store %arg8[%c0_8, %c0_9], %8 {strides = array<i32>} : memref<64x128xf32, #tpu.memory_space<vmem>>, vector<64x128xf32>,
    %c0_10 = arith.constant 0 : index
    %c0_11 = arith.constant 0 : index
    %c0_12 = arith.constant 0 : index
    %c1 = arith.constant 1 : index
    %c0_13 = arith.constant 0 : index
    %10 = vector.load %arg3[%c0_10, %c0_11, %c0_12, %c1, %c0_13] : memref<1x1x9x9x16xbf16, #tpu.memory_space<vmem>>, vector<1x1x8x8x16xbf16>
    %11 = vector.shape_cast %10 : vector<1x1x8x8x16xbf16> to vector<8x8x16xbf16>
    %12 = vector.shape_cast %11 : vector<8x8x16xbf16> to vector<64x16xbf16>
    %c1_14 = arith.constant 1 : index
    %c0_15 = arith.constant 0 : index
    %c0_16 = arith.constant 0 : index
    %13 = vector.load %arg4[%c1_14, %c0_15, %c0_16] : memref<4x16x128xbf16, #tpu.memory_space<vmem>>, vector<1x16x128xbf16>
    %14 = vector.shape_cast %13 : vector<1x16x128xbf16> to vector<16x128xbf16>
    %cst_17 = arith.constant dense<0.000000e+00> : vector<64x128xf32>
    %15 = tpu.matmul %12, %14, %cst_17 {dimension_numbers = #tpu.dot_dimension_numbers<[1], [0], [0], [1], [0, 0, 1, 1], [], []>} : vector<64x16xbf16>, vector<16x128xbf16>, vector<64x128xf32> -> vector<64x128xf32>
    %c0_18 = arith.constant 0 : index
    %c0_19 = arith.constant 0 : index
    %16 = vector.load %arg8[%c0_18, %c0_19] : memref<64x128xf32, #tpu.memory_space<vmem>>, vector<64x128xf32>
    %17 = arith.addf %16, %15 : vector<64x128xf32>
    %c0_20 = arith.constant 0 : index
    %c0_21 = arith.constant 0 : index
    %18 = vector.load %arg8[%c0_20, %c0_21] : memref<64x128xf32, #tpu.memory_space<vmem>>, vector<64x128xf32>
    tpu.vector_store %arg8[%c0_20, %c0_21], %17 {strides = array<i32>} : memref<64x128xf32, #tpu.memory_space<vmem>>, vector<64x128xf32>,
    %c0_22 = arith.constant 0 : index
    %c0_23 = arith.constant 0 : index
    %c1_24 = arith.constant 1 : index
    %c0_25 = arith.constant 0 : index
    %c0_26 = arith.constant 0 : index
    %19 = vector.load %arg3[%c0_22, %c0_23, %c1_24, %c0_25, %c0_26] : memref<1x1x9x9x16xbf16, #tpu.memory_space<vmem>>, vector<1x1x8x8x16xbf16>
    %20 = vector.shape_cast %19 : vector<1x1x8x8x16xbf16> to vector<8x8x16xbf16>
    %21 = vector.shape_cast %20 : vector<8x8x16xbf16> to vector<64x16xbf16>
    %c2 = arith.constant 2 : index
    %c0_27 = arith.constant 0 : index
    %c0_28 = arith.constant 0 : index
    %22 = vector.load %arg4[%c2, %c0_27, %c0_28] : memref<4x16x128xbf16, #tpu.memory_space<vmem>>, vector<1x16x128xbf16>
    %23 = vector.shape_cast %22 : vector<1x16x128xbf16> to vector<16x128xbf16>
    %cst_29 = arith.constant dense<0.000000e+00> : vector<64x128xf32>
    %24 = tpu.matmul %21, %23, %cst_29 {dimension_numbers = #tpu.dot_dimension_numbers<[1], [0], [0], [1], [0, 0, 1, 1], [], []>} : vector<64x16xbf16>, vector<16x128xbf16>, vector<64x128xf32> -> vector<64x128xf32>
    %c0_30 = arith.constant 0 : index
    %c0_31 = arith.constant 0 : index
    %25 = vector.load %arg8[%c0_30, %c0_31] : memref<64x128xf32, #tpu.memory_space<vmem>>, vector<64x128xf32>
    %26 = arith.addf %25, %24 : vector<64x128xf32>
    %c0_32 = arith.constant 0 : index
    %c0_33 = arith.constant 0 : index
    %27 = vector.load %arg8[%c0_32, %c0_33] : memref<64x128xf32, #tpu.memory_space<vmem>>, vector<64x128xf32>
    tpu.vector_store %arg8[%c0_32, %c0_33], %26 {strides = array<i32>} : memref<64x128xf32, #tpu.memory_space<vmem>>, vector<64x128xf32>,
    %c0_34 = arith.constant 0 : index
    %c0_35 = arith.constant 0 : index
    %c1_36 = arith.constant 1 : index
    %c1_37 = arith.constant 1 : index
    %c0_38 = arith.constant 0 : index
    %28 = vector.load %arg3[%c0_34, %c0_35, %c1_36, %c1_37, %c0_38] : memref<1x1x9x9x16xbf16, #tpu.memory_space<vmem>>, vector<1x1x8x8x16xbf16>
    %29 = vector.shape_cast %28 : vector<1x1x8x8x16xbf16> to vector<8x8x16xbf16>
    %30 = vector.shape_cast %29 : vector<8x8x16xbf16> to vector<64x16xbf16>
    %c3 = arith.constant 3 : index
    %c0_39 = arith.constant 0 : index
    %c0_40 = arith.constant 0 : index
    %31 = vector.load %arg4[%c3, %c0_39, %c0_40] : memref<4x16x128xbf16, #tpu.memory_space<vmem>>, vector<1x16x128xbf16>
    %32 = vector.shape_cast %31 : vector<1x16x128xbf16> to vector<16x128xbf16>
    %cst_41 = arith.constant dense<0.000000e+00> : vector<64x128xf32>
    %33 = tpu.matmul %30, %32, %cst_41 {dimension_numbers = #tpu.dot_dimension_numbers<[1], [0], [0], [1], [0, 0, 1, 1], [], []>} : vector<64x16xbf16>, vector<16x128xbf16>, vector<64x128xf32> -> vector<64x128xf32>
    %c0_42 = arith.constant 0 : index
    %c0_43 = arith.constant 0 : index
    %34 = vector.load %arg8[%c0_42, %c0_43] : memref<64x128xf32, #tpu.memory_space<vmem>>, vector<64x128xf32>
    %35 = arith.addf %34, %33 : vector<64x128xf32>
    %c0_44 = arith.constant 0 : index
    %c0_45 = arith.constant 0 : index
    %36 = vector.load %arg8[%c0_44, %c0_45] : memref<64x128xf32, #tpu.memory_space<vmem>>, vector<64x128xf32>
    tpu.vector_store %arg8[%c0_44, %c0_45], %35 {strides = array<i32>} : memref<64x128xf32, #tpu.memory_space<vmem>>, vector<64x128xf32>,
    %c0_46 = arith.constant 0 : index
    %c0_47 = arith.constant 0 : index
    %37 = vector.load %arg8[%c0_46, %c0_47] : memref<64x128xf32, #tpu.memory_space<vmem>>, vector<64x128xf32>
    %c0_48 = arith.constant 0 : index
    %c0_49 = arith.constant 0 : index
    %38 = vector.load %arg9[%c0_48, %c0_49] : memref<1x128xf32, #tpu.memory_space<vmem>>, vector<1x128xf32>
    %cst_50 = arith.constant dense<0.000000e+00> : vector<128xf32>
    %39 = vector.multi_reduction <add>, %37, %cst_50 [0] : vector<64x128xf32> to vector<128xf32>
    %40 = vector.shape_cast %39 : vector<128xf32> to vector<1x128xf32>
    %41 = arith.addf %38, %40 : vector<1x128xf32>
    %c0_51 = arith.constant 0 : index
    %c0_52 = arith.constant 0 : index
    %42 = vector.load %arg9[%c0_51, %c0_52] : memref<1x128xf32, #tpu.memory_space<vmem>>, vector<1x128xf32>
    tpu.vector_store %arg9[%c0_51, %c0_52], %41 {strides = array<i32>} : memref<1x128xf32, #tpu.memory_space<vmem>>, vector<1x128xf32>,
    %c0_53 = arith.constant 0 : index
    %c0_54 = arith.constant 0 : index
    %43 = vector.load %arg10[%c0_53, %c0_54] : memref<1x128xf32, #tpu.memory_space<vmem>>, vector<1x128xf32>
    %44 = arith.mulf %37, %37 : vector<64x128xf32>
    %cst_55 = arith.constant dense<0.000000e+00> : vector<128xf32>
    %45 = vector.multi_reduction <add>, %44, %cst_55 [0] : vector<64x128xf32> to vector<128xf32>
    %46 = vector.shape_cast %45 : vector<128xf32> to vector<1x128xf32>
    %47 = arith.addf %43, %46 : vector<1x128xf32>
    %c0_56 = arith.constant 0 : index
    %c0_57 = arith.constant 0 : index
    %48 = vector.load %arg10[%c0_56, %c0_57] : memref<1x128xf32, #tpu.memory_space<vmem>>, vector<1x128xf32>
    tpu.vector_store %arg10[%c0_56, %c0_57], %47 {strides = array<i32>} : memref<1x128xf32, #tpu.memory_space<vmem>>, vector<1x128xf32>,
    %c64_i32 = arith.constant 64 : i32
    %49 = arith.muli %arg2, %c64_i32 : i32
    %50 = tpu.assume_multiple %49, 8 : i32
    %51 = arith.truncf %37 : vector<64x128xf32> to vector<64x128xbf16>
    %c0_58 = arith.constant 0 : index
    %52 = arith.index_cast %50 : i32 to index
    %c0_59 = arith.constant 0 : index
    %53 = vector.load %arg7[%c0_58, %52, %c0_59] : memref<1x64x128xbf16, #tpu.memory_space<vmem>>, vector<1x64x128xbf16>
    %54 = vector.shape_cast %53 : vector<1x64x128xbf16> to vector<64x128xbf16>
    %55 = vector.shape_cast %51 : vector<64x128xbf16> to vector<1x64x128xbf16>
    tpu.vector_store %arg7[%c0_58, %52, %c0_59], %55 {strides = array<i32>} : memref<1x64x128xbf16, #tpu.memory_space<vmem>>, vector<1x64x128xbf16>,
    %c0_i32_60 = arith.constant 0 : i32
    %56 = arith.cmpi eq, %arg2, %c0_i32_60 : i32
    %57 = arith.extui %56 : i1 to i32
    %c0_i32_61 = arith.constant 0 : i32
    %58 = arith.cmpi ne, %57, %c0_i32_61 : i32
    scf.if %58 {
      %c0_62 = arith.constant 0 : index
      %c0_63 = arith.constant 0 : index
      %59 = vector.load %arg9[%c0_62, %c0_63] : memref<1x128xf32, #tpu.memory_space<vmem>>, vector<1x128xf32>
      %cst_64 = arith.constant 1.562500e-02 : f32
      %60 = vector.broadcast %cst_64 : f32 to vector<1x128xf32>
      %61 = arith.mulf %59, %60 : vector<1x128xf32>
      %c0_65 = arith.constant 0 : index
      %c0_66 = arith.constant 0 : index
      %62 = vector.load %arg10[%c0_65, %c0_66] : memref<1x128xf32, #tpu.memory_space<vmem>>, vector<1x128xf32>
      %cst_67 = arith.constant 1.562500e-02 : f32
      %63 = vector.broadcast %cst_67 : f32 to vector<1x128xf32>
      %64 = arith.mulf %62, %63 : vector<1x128xf32>
      %65 = arith.mulf %61, %61 : vector<1x128xf32>
      %66 = arith.subf %64, %65 : vector<1x128xf32>
      %cst_68 = arith.constant 0.000000e+00 : f32
      %67 = vector.broadcast %cst_68 : f32 to vector<1x128xf32>
      %68 = arith.maximumf %66, %67 : vector<1x128xf32>
      %c0_69 = arith.constant 0 : index
      %c0_70 = arith.constant 0 : index
      %69 = vector.load %arg5[%c0_69, %c0_70] : memref<1x128xf32, #tpu.memory_space<vmem>>, vector<1x128xf32>
      %cst_71 = arith.constant 9.99999974E-6 : f32
      %70 = vector.broadcast %cst_71 : f32 to vector<1x128xf32>
      %71 = arith.addf %68, %70 : vector<1x128xf32>
      %72 = math.rsqrt %71 : vector<1x128xf32>
      %73 = arith.mulf %69, %72 : vector<1x128xf32>
      %c0_72 = arith.constant 0 : index
      %c0_73 = arith.constant 0 : index
      %74 = vector.load %arg6[%c0_72, %c0_73] : memref<1x128xf32, #tpu.memory_space<vmem>>, vector<1x128xf32>
      %75 = arith.mulf %61, %73 : vector<1x128xf32>
      %76 = arith.subf %74, %75 : vector<1x128xf32>
      %77 = vector.shape_cast %73 : vector<1x128xf32> to vector<1x128xf32>
      %78 = vector.broadcast %77 : vector<1x128xf32> to vector<64x128xf32>
      %79 = vector.shape_cast %76 : vector<1x128xf32> to vector<1x128xf32>
      %80 = vector.broadcast %79 : vector<1x128xf32> to vector<64x128xf32>
      %c0_i32_74 = arith.constant 0 : i32
      %c64_i32_75 = arith.constant 64 : i32
      %81 = arith.muli %c0_i32_74, %c64_i32_75 : i32
      %82 = tpu.assume_multiple %81, 8 : i32
      %c0_76 = arith.constant 0 : index
      %83 = arith.index_cast %82 : i32 to index
      %c0_77 = arith.constant 0 : index
      %84 = vector.load %arg7[%c0_76, %83, %c0_77] : memref<1x64x128xbf16, #tpu.memory_space<vmem>>, vector<1x64x128xbf16>
      %85 = vector.shape_cast %84 : vector<1x64x128xbf16> to vector<64x128xbf16>
      %86 = arith.extf %85 : vector<64x128xbf16> to vector<64x128xf32>
      %87 = arith.mulf %86, %78 : vector<64x128xf32>
      %88 = arith.addf %87, %80 : vector<64x128xf32>
      %cst_78 = arith.constant 0.000000e+00 : f32
      %89 = vector.broadcast %cst_78 : f32 to vector<64x128xf32>
      %90 = arith.maximumf %88, %89 : vector<64x128xf32>
      %91 = arith.truncf %90 : vector<64x128xf32> to vector<64x128xbf16>
      %c0_79 = arith.constant 0 : index
      %92 = arith.index_cast %82 : i32 to index
      %c0_80 = arith.constant 0 : index
      %93 = vector.load %arg7[%c0_79, %92, %c0_80] : memref<1x64x128xbf16, #tpu.memory_space<vmem>>, vector<1x64x128xbf16>
      %94 = vector.shape_cast %93 : vector<1x64x128xbf16> to vector<64x128xbf16>
      %95 = vector.shape_cast %91 : vector<64x128xbf16> to vector<1x64x128xbf16>
      tpu.vector_store %arg7[%c0_79, %92, %c0_80], %95 {strides = array<i32>} : memref<1x64x128xbf16, #tpu.memory_space<vmem>>, vector<1x64x128xbf16>,
      %c1_i32 = arith.constant 1 : i32
    } else {
    }
    return
  }
  func.func @transform_0(%arg0: i32, %arg1: i32, %arg2: i32) -> (i32, i32, i32, i32, i32) {
    %c0_i32 = arith.constant 0 : i32
    %c0_i32_0 = arith.constant 0 : i32
    %c0_i32_1 = arith.constant 0 : i32
    %c0_i32_2 = arith.constant 0 : i32
    return %arg0, %arg2, %c0_i32, %c0_i32_0, %c0_i32_1 : i32, i32, i32, i32, i32
  }
  func.func @transform_1(%arg0: i32, %arg1: i32, %arg2: i32) -> (i32, i32, i32) {
    %c0_i32 = arith.constant 0 : i32
    %c0_i32_0 = arith.constant 0 : i32
    %c0_i32_1 = arith.constant 0 : i32
    return %c0_i32, %c0_i32_0, %arg1 : i32, i32, i32
  }
  func.func @transform_2(%arg0: i32, %arg1: i32, %arg2: i32) -> (i32, i32) {
    %c0_i32 = arith.constant 0 : i32
    %c0_i32_0 = arith.constant 0 : i32
    return %c0_i32, %arg1 : i32, i32
  }
  func.func @transform_3(%arg0: i32, %arg1: i32, %arg2: i32) -> (i32, i32) {
    %c0_i32 = arith.constant 0 : i32
    %c0_i32_0 = arith.constant 0 : i32
    return %c0_i32, %arg1 : i32, i32
  }
  func.func @transform_4(%arg0: i32, %arg1: i32, %arg2: i32) -> (i32, i32, i32) {
    %c0_i32 = arith.constant 0 : i32
    %c0_i32_0 = arith.constant 0 : i32
    return %arg0, %c0_i32, %arg1 : i32, i32, i32
  }
}

</mosaic_0001>

<bundles_post_ra>
// kernel: block_forward.1
= control target key start
LH: loop header
LB: loop body
LE: loop exit
PB: predicated region body
PF: predicated region fallthrough
CT: control target
= control target key end

     0   :  { %s1715_s15 = smov 0   ;;  %s1717_s16 = smov 0   ;;  %s1894_s0 = inlined_call_operand.vmem [shape: bf16[2,1,9,9,16], index: 0, kind: input, shape index: {}]   ;;  %s1895_s1 = inlined_call_operand.vmem [shape: bf16[4,16,128], index: 1, kind: input, shape index: {}]   ;;  %s1896_s2 = inlined_call_operand.vmem [shape: f32[1,128], index: 2, kind: input, shape index: {}]   ;;  %s1897_s3 = inlined_call_operand.vmem [shape: f32[1,128], index: 3, kind: input, shape index: {}]   ;;  %s1898_s4 = inlined_call_operand.vmem [shape: bf16[2,64,128], index: 4, kind: output, shape index: {}]  }
   0x1   :  { %s1719_s17 = smov 0  }
   0x2 LB: > { %s33_s18 = sadd.s32 1, %s1683_s16  ;;  %p1395_p0 = scmp.ge.s32.totalorder %s1687_s17, 1  ;;  %s1687_s17 = sphi %s1719_s17, %s14_s17   ;;  %s1683_s16 = sphi %s1717_s16, %s1902_s16   ;;  %s1679_s15 = sphi %s1715_s15, %s1901_s15  }
   0x3   : > { %p35_p1 = scmp.ge.s32.totalorder %s33_s18, 2  ;;  %p214_p2 = scmp.lt.s32.totalorder %s1687_s17, 3 }
   0x5   : > { %s1904_s18 = smov (%p35_p1, %s33_s18), 0  ;;  %p215_p3 = pnand %p1395_p0, %p214_p2 }
   0x6   : > { %p257_p4 = scmp.lt.s32.totalorder (!%p215_p3), %s1679_s15, 1 }
   0x7   : > { %218 = sbr.rel (%p215_p3) target bundleno = 332 (0x14c), region = 36 }
   0xc   : > { %v1651_v0 = vld [vmem:[%s1895_s1] sm:$0xff]   ;;  %v1654_v1 = vld [vmem:[%s1895_s1 + $0x8] sm:$0xff]   ;;  %s1906_s15 = smov (!%p257_p4, %s1679_s15), 1  ;;  %v1655_v2 = vld [vmem:[%s1895_s1 + $0x10] sm:$0xff]   ;;  %vm327_vm0 = vcmask 130048  }
   0xd   : > { %1585 = vmatprep.subr.bf16.mxu0 %v1651_v0  ;;  %1595 = vmatprep.subr.bf16.mxu1 %v1654_v1  ;;  %s1625_s25 = smul.u32 72, %s1906_s15  ;;  %v1748_v3 = vld [vmem:[%s1895_s1 + $0x18] sm:$0xff]   ;;  %vm429_vm1 = vsmask.f32 3328  ;;  %vm430_vm2 = vsmask.f32 7440 }
   0xe   : > { %1586 = vmatpush3.bf16.msra.mxu0 %v1651_v0  ;;  %1596 = vmatpush3.bf16.msra.mxu1 %v1654_v1  ;;  %vm1773_vm3 = vmor %vm429_vm1, %vm430_vm2  ;;  %s1483_s9 = sshll.u32 %s1906_s15, 5 }
   0xf   : > { %1605 = vmatprep.subr.bf16.mxu0 %v1655_v2  ;;  %s1753_s30 = scalar_lea.vmem %s1894_s0, %s1625_s25  ;;  %1615 = vmatprep.subr.bf16.mxu1 %v1748_v3  ;;  %s283_s12 = scalar_lea.vmem %s1898_s4, %s1483_s9 }
  0x10   : > { %v1652_v4 = vld [vmem:[%s1753_s30] ss:$8 sps:$4 sm:$0xff]   ;;  %v1653_v5 = vld [vmem:[%s1753_s30 + $0x10] ss:$8 sps:$4 sm:$0xff]   ;;  %v414_v8 = vld [vmem:[%s1753_s30 + $0x4] sm:$0x1] }
  0x11   : > { %1587 = vmatprep.mubr.msk.bf16.mxu0 %vm327_vm0, %v1652_v4  ;;  %v1656_v6 = vld [vmem:[%s1753_s30 + $0x20] ss:$8 sps:$4 sm:$0xff]   ;;  %v1657_v10 = vld [vmem:[%s1753_s30 + $0x30] ss:$8 sps:$4 sm:$0xff]   ;;  %v416_v11 = vld [vmem:[%s1753_s30 + $0xc] sm:$0x1] }
  0x12   : > { %1588 = vmatmul.mubr.msk.bf16.vlgmr.msra.gmra.mxu0 %vm327_vm0, %v1653_v5  ;;  %v413_v7 = vld [vmem:[%s1753_s30] sm:$0xf]  ;;  %v415_v9 = vld [vmem:[%s1753_s30 + $0x8] sm:$0xf]  ;;  %v442_v14 = vshll.u32 %v414_v8, 16  ;;  %v456_v17 = vshll.u32 %v416_v11, 16 }
  0x13   : > { %1591 = vmatprep.mubr.msk.bf16.mxu0 %vm327_vm0, %v1656_v6  ;;  %1606 = vmatpush3.bf16.msra.mxu0 %v1655_v2  ;;  %v433_v12 = vshrl.u32 %v413_v7, 16  ;;  %v436_v13 = vshll.u32 %v413_v7, 16  ;;  %v447_v15 = vshrl.u32 %v415_v9, 16  ;;  %v450_v16 = vshll.u32 %v415_v9, 16  ;;  %v417_v18 = vld [vmem:[%s1753_s30 + $0x10] sm:$0xf] }
  0x14   : > { %v418_v19 = vld [vmem:[%s1753_s30 + $0x14] sm:$0x1]  ;;  %v444_v22 = vrot.slane %v442_v14, 5  ;;  %v419_v24 = vld [vmem:[%s1753_s30 + $0x18] sm:$0xf]  ;;  %v458_v26 = vrot.slane %v456_v17, 5 }
  0x15   : > { %v435_v20 = vrot.slane %v433_v12, 4  ;;  %v438_v21 = vrot.slane %v436_v13, 5  ;;  %v449_v23 = vrot.slane %v447_v15, 4  ;;  %v452_v25 = vrot.slane %v450_v16, 5  ;;  %v420_v27 = vld [vmem:[%s1753_s30 + $0x1c] sm:$0x1] }
  0x16   : > { %v461_v28 = vshrl.u32 %v417_v18, 16  ;;  %v464_v29 = vshll.u32 %v417_v18, 16  ;;  %v470_v31 = vshll.u32 %v418_v19, 16  ;;  %v475_v32 = vshrl.u32 %v419_v24, 16  ;;  %v1659_v43 = vld [vmem:[%s1753_s30 + $0x8] ss:$8 sps:$4 sm:$0xff]  }
  0x17   : > { %v439_v30 = vor.u32 %v438_v21, %v435_v20  ;;  %v478_v33 = vshll.u32 %v419_v24, 16  ;;  %v453_v35 = vor.u32 %v452_v25, %v449_v23  ;;  %v484_v38 = vshll.u32 %v420_v27, 16  ;;  %v421_v47 = vld [vmem:[%s1753_s30 + $0x20] sm:$0xf]  ;;  %v422_v48 = vld [vmem:[%s1753_s30 + $0x24] sm:$0x1] }
  0x18   : > { %v463_v36 = vrot.slane %v461_v28, 4  ;;  %v466_v37 = vrot.slane %v464_v29, 5  ;;  %v472_v40 = vrot.slane %v470_v31, 5  ;;  %v477_v41 = vrot.slane %v475_v32, 4  ;;  %v423_v51 = vld [vmem:[%s1753_s30 + $0x28] sm:$0xf] }
  0x19   : > { %v440_v39 = vrot.slane %v439_v30, 4  ;;  %v480_v42 = vrot.slane %v478_v33, 5  ;;  %v454_v44 = vrot.slane %v453_v35, 4  ;;  %v486_v46 = vrot.slane %v484_v38, 5  ;;  %v424_v52 = vld [vmem:[%s1753_s30 + $0x2c] sm:$0x1] }
  0x1a   : > { %1592 = vmatmul.mubr.msk.bf16.gmra.mxu0 %vm327_vm0, %v1657_v10  ;;  %v467_v45 = vor.u32 %v466_v37, %v463_v36  ;;  %v489_v53 = vshrl.u32 %v421_v47, 16  ;;  %v492_v54 = vshll.u32 %v421_v47, 16  ;;  %v498_v57 = vshll.u32 %v422_v48, 16  ;;  %v1660_v2 = vld [vmem:[%s1753_s30 + $0x18] ss:$8 sps:$4 sm:$0xff]  }
  0x1b   : > { %v445_v49 = vsel %vm1773_vm3, %v440_v39, %v444_v22  ;;  %v481_v50 = vor.u32 %v480_v42, %v477_v41  ;;  %1607 = vmatprep.mubr.msk.bf16.mxu0 %vm327_vm0, %v1659_v43  ;;  %v459_v55 = vsel %vm1773_vm3, %v454_v44, %v458_v26  ;;  %v503_v58 = vshrl.u32 %v423_v51, 16  ;;  %v425_v8 = vld [vmem:[%s1753_s30 + $0x30] sm:$0xf]  ;;  %v426_v9 = vld [vmem:[%s1753_s30 + $0x34] sm:$0x1] }
  0x1c   : > { %v468_v56 = vrot.slane %v467_v45, 4  ;;  %v1410_v59 = vcombine.low %v445_v49, %v459_v55  ;;  %v491_v61 = vrot.slane %v489_v53, 4  ;;  %v494_v62 = vrot.slane %v492_v54, 5  ;;  %v427_v12 = vld [vmem:[%s1753_s30 + $0x38] sm:$0xf] }
  0x1d   : > { %v482_v60 = vrot.slane %v481_v50, 4  ;;  %v505_v0 = vrot.slane %v503_v58, 4  ;;  %v506_v1 = vshll.u32 %v423_v51, 16  ;;  %v500_v6 = vrot.slane %v498_v57, 5  ;;  %v428_v13 = vld [vmem:[%s1753_s30 + $0x3c] sm:$0x1] }
  0x1e   : > { %v473_v63 = vsel %vm1773_vm3, %v468_v56, %v472_v40  ;;  %1597 = vmatprep.mubr.msk.bf16.mxu1 %vm327_vm0, %v1410_v59  ;;  %v495_v5 = vor.u32 %v494_v62, %v491_v61  ;;  %v512_v7 = vshll.u32 %v424_v52, 16  ;;  %v517_v14 = vshrl.u32 %v425_v8, 16  ;;  %v1661_v25 = vld [vmem:[%s1753_s30 + $0x28] ss:$8 sps:$4 sm:$0xff]   ;;  %v1662_v33 = vld [vmem:[%s1753_s30 + $0x38] ss:$8 sps:$4 sm:$0xff]  }
  0x1f   : > { %v487_v4 = vsel %vm1773_vm3, %v482_v60, %v486_v46  ;;  %v508_v11 = vrot.slane %v506_v1, 5  ;;  %v520_v17 = vshll.u32 %v425_v8, 16  ;;  %v526_v18 = vshll.u32 %v426_v9, 16  ;;  %v1438_v36 = vld [vmem:[%s1753_s30 + $0x8] sm:$0xf] }
  0x20   : > { %v1411_v10 = vcombine.low %v473_v63, %v487_v4  ;;  %v496_v15 = vrot.slane %v495_v5, 4  ;;  %v514_v16 = vrot.slane %v512_v7, 5  ;;  %v519_v20 = vrot.slane %v517_v14, 4  ;;  %v1439_v37 = vld [vmem:[%s1753_s30 + $0xc] sm:$0x1] }
  0x21   : > { %v509_v19 = vor.u32 %v508_v11, %v505_v0  ;;  %v531_v21 = vshrl.u32 %v427_v12, 16  ;;  %v534_v22 = vshll.u32 %v427_v12, 16  ;;  %v522_v23 = vrot.slane %v520_v17, 5  ;;  %v1440_v38 = vld [vmem:[%s1753_s30 + $0x10] sm:$0xf] }
  0x22   : > { %1608 = vmatmul.mubr.msk.bf16.vlgmr.msra.gmra.mxu0 %vm327_vm0, %v1660_v2  ;;  %1598 = vmatmul.mubr.msk.bf16.vlgmr.msra.gmra.mxu1 %vm327_vm0, %v1411_v10  ;;  %v540_v24 = vshll.u32 %v428_v13, 16  ;;  %v501_v26 = vsel %vm1773_vm3, %v496_v15, %v500_v6  ;;  %v528_v31 = vrot.slane %v526_v18, 5  ;;  %v1441_v41 = vld [vmem:[%s1753_s30 + $0x14] sm:$0x1]  ;;  %v822_v42 = vshrl.u32 %v1438_v36, 16 }
  0x23   : > { %1616 = vmatpush3.bf16.msra.mxu1 %v1748_v3  ;;  %v510_v27 = vrot.slane %v509_v19, 4  ;;  %v533_v28 = vrot.slane %v531_v21, 4  ;;  %v536_v29 = vrot.slane %v534_v22, 5  ;;  %v523_v30 = vor.u32 %v522_v23, %v519_v20  ;;  %1611 = vmatprep.mubr.msk.bf16.mxu0 %vm327_vm0, %v1661_v25  ;;  %v1442_v48 = vld [vmem:[%s1753_s30 + $0x18] sm:$0xf] }
  0x24   : > { %v542_v32 = vrot.slane %v540_v24, 5  ;;  %v825_v43 = vshll.u32 %v1438_v36, 16  ;;  %v831_v45 = vshll.u32 %v1439_v37, 16  ;;  %v836_v46 = vshrl.u32 %v1440_v38, 16  ;;  %v1443_v53 = vld [vmem:[%s1753_s30 + $0x1c] sm:$0x1] }
  0x25   : > { %v515_v3 = vsel %vm1773_vm3, %v510_v27, %v514_v16  ;;  %v537_v35 = vor.u32 %v536_v29, %v533_v28  ;;  %v524_v40 = vrot.slane %v523_v30, 4  ;;  %v839_v47 = vshll.u32 %v1440_v38, 16  ;;  %v1444_v58 = vld [vmem:[%s1753_s30 + $0x20] sm:$0xf]  ;;  %v1445_v62 = vld [vmem:[%s1753_s30 + $0x24] sm:$0x1] }
  0x26   : > { %v1412_v39 = vcombine.low %v501_v26, %v515_v3  ;;  %v824_v50 = vrot.slane %v822_v42, 4  ;;  %v827_v51 = vrot.slane %v825_v43, 5  ;;  %v845_v52 = vshll.u32 %v1441_v41, 16  ;;  %v1446_v5 = vld [vmem:[%s1753_s30 + $0x28] sm:$0xf] }
  0x27   : > { %v538_v44 = vrot.slane %v537_v35, 4  ;;  %v529_v49 = vsel %vm1773_vm3, %v524_v40, %v528_v31  ;;  %v833_v55 = vrot.slane %v831_v45, 5  ;;  %v838_v56 = vrot.slane %v836_v46, 4  ;;  %v1447_v10 = vld [vmem:[%s1753_s30 + $0x2c] sm:$0x1] }
  0x28   : > { %1601 = vmatprep.mubr.msk.bf16.mxu1 %vm327_vm0, %v1412_v39  ;;  %v841_v57 = vrot.slane %v839_v47, 5  ;;  %v828_v60 = vor.u32 %v827_v51, %v824_v50  ;;  %v847_v61 = vrot.slane %v845_v52, 5  ;;  %v850_v63 = vshrl.u32 %v1442_v48, 16  ;;  %v1448_v15 = vld [vmem:[%s1753_s30 + $0x30] sm:$0xf] }
  0x29   : > { %v543_v54 = vsel %vm1773_vm3, %v538_v44, %v542_v32  ;;  %v853_v1 = vshll.u32 %v1442_v48, 16  ;;  %v859_v2 = vshll.u32 %v1443_v53, 16  ;;  %v864_v4 = vshrl.u32 %v1444_v58, 16  ;;  %v1449_v22 = vld [vmem:[%s1753_s30 + $0x34] sm:$0x1] }
  0x2a   : > { %1612 = vmatmul.mubr.msk.bf16.gmra.mxu0 %vm327_vm0, %v1662_v33  ;;  %v1413_v59 = vcombine.low %v529_v49, %v543_v54  ;;  %v842_v0 = vor.u32 %v841_v57, %v838_v56  ;;  %v829_v6 = vrot.slane %v828_v60, 4  ;;  %v852_v7 = vrot.slane %v850_v63, 4  ;;  %v1450_v25 = vld [vmem:[%s1753_s30 + $0x38] sm:$0xf]  ;;  %v1451_v3 = vld [vmem:[%s1753_s30 + $0x3c] sm:$0x1] }
  0x2b   : > { %v867_v8 = vshll.u32 %v1444_v58, 16  ;;  %v873_v9 = vshll.u32 %v1445_v62, 16  ;;  %v855_v12 = vrot.slane %v853_v1, 5  ;;  %v861_v13 = vrot.slane %v859_v2, 5  ;;  %v1452_v42 = vld [vmem:[%s1753_s30 + $0x40] sm:$0xf] }
  0x2c   : > { %1602 = vmatmul.mubr.msk.bf16.gmra.mxu1 %vm327_vm0, %v1413_v59  ;;  %v843_v11 = vrot.slane %v842_v0, 4  ;;  %v866_v14 = vrot.slane %v864_v4, 4  ;;  %v834_v16 = vsel %vm1773_vm3, %v829_v6, %v833_v55  ;;  %v878_v19 = vshrl.u32 %v1446_v5, 16  ;;  %v1453_v43 = vld [vmem:[%s1753_s30 + $0x44] sm:$0x1] }
  0x2d   : > { %v869_v17 = vrot.slane %v867_v8, 5  ;;  %v875_v18 = vrot.slane %v873_v9, 5  ;;  %v856_v21 = vor.u32 %v855_v12, %v852_v7  ;;  %v881_v23 = vshll.u32 %v1446_v5, 16 }
  0x2e   : > { %v848_v20 = vsel %vm1773_vm3, %v843_v11, %v847_v61  ;;  %v887_v24 = vshll.u32 %v1447_v10, 16  ;;  %v880_v28 = vrot.slane %v878_v19, 4  ;;  %v892_v29 = vshrl.u32 %v1448_v15, 16 }
  0x2f   : > { %v1456_v26 = vcombine.low %v834_v16, %v848_v20  ;;  %v870_v27 = vor.u32 %v869_v17, %v866_v14  ;;  %v857_v30 = vrot.slane %v856_v21, 4  ;;  %v883_v31 = vrot.slane %v881_v23, 5 }
  0x30   : > { %v889_v32 = vrot.slane %v887_v24, 5  ;;  %v895_v33 = vshll.u32 %v1448_v15, 16  ;;  %v894_v36 = vrot.slane %v892_v29, 4  ;;  %v901_v37 = vshll.u32 %v1449_v22, 16 }
  0x31   : > { %1617 = vmatprep.mubr.msk.bf16.mxu1 %vm327_vm0, %v1456_v26  ;;  %v871_v35 = vrot.slane %v870_v27, 4  ;;  %v906_v38 = vshrl.u32 %v1450_v25, 16  ;;  %v862_v39 = vsel %vm1773_vm3, %v857_v30, %v861_v13  ;;  %v884_v40 = vor.u32 %v883_v31, %v880_v28 }
  0x32   : > { %v897_v41 = vrot.slane %v895_v33, 5  ;;  %v909_v44 = vshll.u32 %v1450_v25, 16  ;;  %v903_v46 = vrot.slane %v901_v37, 5  ;;  %v915_v48 = vshll.u32 %v1451_v3, 16 }
  0x33   : > { %v876_v45 = vsel %vm1773_vm3, %v871_v35, %v875_v18  ;;  %v908_v47 = vrot.slane %v906_v38, 4  ;;  %v885_v50 = vrot.slane %v884_v40, 4  ;;  %v920_v53 = vshrl.u32 %v1452_v42, 16 }
  0x34   : > { %v1457_v49 = vcombine.low %v862_v39, %v876_v45  ;;  %v898_v51 = vor.u32 %v897_v41, %v894_v36  ;;  %v911_v52 = vrot.slane %v909_v44, 5  ;;  %v923_v54 = vshll.u32 %v1452_v42, 16 }
  0x35   : > { %v929_v55 = vshll.u32 %v1453_v43, 16  ;;  %v890_v56 = vsel %vm1773_vm3, %v885_v50, %v889_v32  ;;  %v917_v59 = vrot.slane %v915_v48, 5  ;;  %v922_v60 = vrot.slane %v920_v53, 4 }
  0x36   : > { %1618 = vmatmul.mubr.msk.bf16.vlgmr.msra.gmra.mxu1 %vm327_vm0, %v1457_v49  ;;  %v899_v57 = vrot.slane %v898_v51, 4  ;;  %v912_v58 = vor.u32 %v911_v52, %v908_v47  ;;  %v925_v61 = vrot.slane %v923_v54, 5  ;;  %v1689_v8 = vmov 0.0  }
  0x37   : > { %v931_v2 = vrot.slane %v929_v55, 5  ;;  %289 = vst [vmem:[#allocation3] sm:$0x1] %v1689_v8  ;;  %290 = vst [vmem:[#allocation4] sm:$0x1] %v1689_v8 }
  0x38   : > { %v904_v62 = vsel %vm1773_vm3, %v899_v57, %v903_v46  ;;  %v913_v63 = vrot.slane %v912_v58, 4  ;;  %v926_v1 = vor.u32 %v925_v61, %v922_v60 }
  0x39   : > { %v1458_v0 = vcombine.low %v890_v56, %v904_v62 }
  0x3a   : > { %v918_v4 = vsel %vm1773_vm3, %v913_v63, %v917_v59  ;;  %v927_v5 = vrot.slane %v926_v1, 4 }
  0x3b   : > { %1621 = vmatprep.mubr.msk.bf16.mxu1 %vm327_vm0, %v1458_v0 }
  0x3c   : > { %v932_v6 = vsel %vm1773_vm3, %v927_v5, %v931_v2 }
  0x3d   : > { %v1459_v7 = vcombine.low %v918_v4, %v932_v6 }
  0x3f   : > { %1622 = vmatmul.mubr.msk.bf16.gmra.mxu1 %vm327_vm0, %v1459_v7 }
  0xd2   : > { %v1589_v9 = vpop.f32.mrf.mxu0 }
  0xd4   : > { %v374_v10 = vpop.f32.mrf.mxu0 }
  0xd6   : > { %v1590_v11 = vpop.f32.mrf.mxu0 }
  0xd8   : > { %v377_v12 = vpop.f32.mrf.mxu0 }
  0xda   : > { %v1593_v13 = vpop.f32.mrf.mxu0 }
  0xdc   : > { %v390_v14 = vpop.f32.mrf.mxu0 }
  0xde   : > { %v1594_v15 = vpop.f32.mrf.mxu0 }
  0xe0   : > { %v393_v18 = vpop.f32.mrf.mxu0 }
  0xe2   : > { %v1599_v16 = vpop.f32.mrf.mxu1  ;;  %v1609_v20 = vpop.f32.mrf.mxu0 }
  0xe3   : > { %v652_v32 = vadd.f32 %v1599_v16, %v1589_v9 }
  0xe4   : > { %v611_v17 = vpop.f32.mrf.mxu1  ;;  %v750_v21 = vpop.f32.mrf.mxu0 }
  0xe5   : > { %v650_v30 = vadd.f32 %v611_v17, %v374_v10  ;;  %v791_v38 = vadd.f32 %v1609_v20, %v652_v32 }
  0xe6   : > { %v1600_v19 = vpop.f32.mrf.mxu1  ;;  %v1610_v24 = vpop.f32.mrf.mxu0 }
  0xe7   : > { %v789_v3 = vadd.f32 %v750_v21, %v650_v30  ;;  %v653_v37 = vadd.f32 %v1600_v19, %v1590_v11 }
  0xe8   : > { %v614_v34 = vpop.f32.mrf.mxu1  ;;  %v753_v26 = vpop.f32.mrf.mxu0 }
  0xe9   : > { %v651_v33 = vadd.f32 %v614_v34, %v377_v12  ;;  %v792_v42 = vadd.f32 %v1610_v24, %v653_v37 }
  0xea   : > { %v1613_v28 = vpop.f32.mrf.mxu0 }
  0xeb   : > { %v790_v39 = vadd.f32 %v753_v26, %v651_v33 }
  0xec   : > { %v1603_v22 = vpop.f32.mrf.mxu1  ;;  %v766_v35 = vpop.f32.mrf.mxu0 }
  0xed   : > { %v656_v56 = vadd.f32 %v1603_v22, %v1593_v13 }
  0xee   : > { %v627_v23 = vpop.f32.mrf.mxu1  ;;  %v1614_v46 = vpop.f32.mrf.mxu0 }
  0xef   : > { %v654_v45 = vadd.f32 %v627_v23, %v390_v14  ;;  %v795_v1 = vadd.f32 %v1613_v28, %v656_v56 }
  0xf0   : > { %v1604_v25 = vpop.f32.mrf.mxu1  ;;  %v769_v58 = vpop.f32.mrf.mxu0 }
  0xf1   : > { %v793_v53 = vadd.f32 %v766_v35, %v654_v45  ;;  %v657_v0 = vadd.f32 %v1604_v25, %v1594_v15 }
  0xf2   : > { %v630_v27 = vpop.f32.mrf.mxu1 }
  0xf3   : > { %v655_v57 = vadd.f32 %v630_v27, %v393_v18  ;;  %v796_v9 = vadd.f32 %v1614_v46, %v657_v0 }
  0xf5   : > { %v794_v4 = vadd.f32 %v769_v58, %v655_v57 }
  0xf6   : > { %v1619_v29 = vpop.f32.mrf.mxu1 }
  0xf7   : > { %v1853_v43 = vadd.f32 %v1619_v29, %v791_v38 }
  0xf8   : > { %v1000_v31 = vpop.f32.mrf.mxu1 }
  0xf9   : > { %v1851_v40 = vadd.f32 %v1000_v31, %v789_v3  ;;  %v1082_v52 = vmul.f32 %v1853_v43, %v1853_v43  ;;  %v1063_v31 = vld [vmem:[#allocation3] sm:$0x1]  ;;  %v1079_v3 = vld [vmem:[#allocation4] sm:$0x1] }
  0xfa   : > { %v1620_v36 = vpop.f32.mrf.mxu1 }
  0xfb   : > { %v1080_v47 = vmul.f32 %v1851_v40, %v1851_v40  ;;  %v1859_v48 = vadd.f32 %v1620_v36, %v792_v42 }
  0xfc   : > { %v1003_v41 = vpop.f32.mrf.mxu1 }
  0xfd   : > { %v1855_v44 = vadd.f32 %v1003_v41, %v790_v39  ;;  %v1083_v60 = vmul.f32 %v1859_v48, %v1859_v48 }
  0xff   : > { %v1064_v49 = vadd.f32 %v1855_v44, %v1851_v40  ;;  %v1081_v50 = vmul.f32 %v1855_v44, %v1855_v44  ;;  %v1623_v51 = vpop.f32.mrf.mxu1  ;;  %v1503_v56 = vpack.c.bf16 %v1855_v44, %v1851_v40 }
 0x100   : > { %v1045_v10 = vadd.f32 %v1623_v51, %v795_v1 }
 0x101   : > { %v1065_v54 = vadd.f32 %v1064_v49, %v1853_v43  ;;  %v1088_v55 = vadd.f32 %v1081_v50, %v1080_v47  ;;  %v1016_v59 = vpop.f32.mrf.mxu1  ;;  %v1166_v50 = vlaneseq  ;;  %v1522_v1 = vunpack.c.l.bf16 %v1503_v56 }
 0x102   : > { %v1043_v62 = vadd.f32 %v1016_v59, %v793_v53  ;;  %v1086_v17 = vmul.f32 %v1045_v10, %v1045_v10 }
 0x103   : > { %v1089_v61 = vadd.f32 %v1088_v55, %v1082_v52  ;;  %v1066_v63 = vadd.f32 %v1065_v54, %v1859_v48  ;;  %v1624_v2 = vpop.f32.mrf.mxu1  ;;  %v1167_v51 = vshrl.u32 %v1166_v50, 7  ;;  %v1158_v52 = vld [vmem:[%s1896_s2] sm:$0x1]  ;;  %v1508_v55 = vpack.c.bf16 %v1859_v48, %v1853_v43 }
 0x104   : > { %v1084_v6 = vmul.f32 %v1043_v62, %v1043_v62  ;;  %v1046_v13 = vadd.f32 %v1624_v2, %v796_v9 }
 0x105   : > { %v1067_v5 = vadd.f32 %v1066_v63, %v1043_v62  ;;  %v1090_v7 = vadd.f32 %v1089_v61, %v1083_v60  ;;  %v1019_v8 = vpop.f32.mrf.mxu1  ;;  %v1168_v53 = vsub.s32 0, %v1167_v51  ;;  %v1162_v60 = vld [vmem:[%s1897_s3] sm:$0x1]  ;;  %v1526_v0 = vunpack.c.l.bf16 %v1508_v55 }
 0x106   : > { %v1044_v12 = vadd.f32 %v1019_v8, %v794_v4  ;;  %v1087_v20 = vmul.f32 %v1046_v13, %v1046_v13  ;;  %v1518_v57 = vpack.c.bf16 %v1046_v13, %v1045_v10  ;;  %v1527_v2 = vunpack.c.h.bf16 %v1508_v55 }
 0x107   : > { %v1091_v11 = vadd.f32 %v1090_v7, %v1084_v6  ;;  %v1523_v4 = vunpack.c.h.bf16 %v1503_v56 }
 0x108   : > { %v1068_v14 = vadd.f32 %v1067_v5, %v1044_v12  ;;  %v1085_v16 = vmul.f32 %v1044_v12, %v1044_v12  ;;  %v1513_v59 = vpack.c.bf16 %v1044_v12, %v1043_v62  ;;  %v1534_v5 = vunpack.c.l.bf16 %v1518_v57 }
 0x109   : > { %v1535_v43 = vunpack.c.h.bf16 %v1518_v57 }
 0x10a   : > { %v1069_v18 = vadd.f32 %v1068_v14, %v1045_v10  ;;  %v1092_v19 = vadd.f32 %v1091_v11, %v1085_v16  ;;  %v1530_v48 = vunpack.c.l.bf16 %v1513_v59  ;;  %v1531_v7 = vunpack.c.h.bf16 %v1513_v59 }
 0x10c   : > { %v1070_v34 = vadd.f32 %v1069_v18, %v1046_v13  ;;  %v1093_v15 = vadd.f32 %v1092_v19, %v1086_v17 }
 0x10e   : > { %v1071_v21 = vrot.slane %v1070_v34, 4  ;;  %v1094_v22 = vadd.f32 %v1093_v15, %v1087_v20 }
 0x110   : > { %v1072_v23 = vadd.f32 %v1071_v21, %v1070_v34  ;;  %v1095_v24 = vrot.slane %v1094_v22, 4 }
 0x112   : > { %v1073_v25 = vrot.slane %v1072_v23, 2  ;;  %v1096_v26 = vadd.f32 %v1095_v24, %v1094_v22 }
 0x114   : > { %v1074_v27 = vadd.f32 %v1073_v25, %v1072_v23  ;;  %v1097_v28 = vrot.slane %v1096_v26, 2 }
 0x116   : > { %v1075_v29 = vrot.slane %v1074_v27, 1  ;;  %v1098_v30 = vadd.f32 %v1097_v28, %v1096_v26 }
 0x118   : > { %v1076_v32 = vadd.f32 %v1075_v29, %v1074_v27  ;;  %v1099_v33 = vrot.slane %v1098_v30, 1 }
 0x11a   : > { %v1077_v35 = vadd.f32 %v1076_v32, %v1063_v31  ;;  %v1100_v36 = vadd.f32 %v1099_v33, %v1098_v30 }
 0x11c   : > { %1078 = vst [vmem:[#allocation3] sm:$0x1] %v1077_v35  ;;  %v1101_v37 = vadd.f32 %v1100_v36, %v1079_v3 }
 0x11e   : > { %1102 = vst [vmem:[#allocation4] sm:$0x1] %v1101_v37 }
 0x123   : > { %v1151_v38 = vld [vmem:[#allocation3] sm:$0x1] }
 0x124   : > { %v1152_v39 = vmul.f32 0.015625, %v1151_v38 }
 0x125   : > { %v1153_v41 = vld [vmem:[#allocation4] sm:$0x1] }
 0x126   : > { %v1154_v42 = vmul.f32 0.015625, %v1153_v41  ;;  %v1155_v45 = vmul.f32 %v1152_v39, %v1152_v39 }
 0x128   : > { %v1156_v46 = vsub.f32 %v1154_v42, %v1155_v45 }
 0x12a   : > { %v1157_v47 = vmax.f32 %v1156_v46, 0.0 }
 0x12c   : > { %v1159_v49 = vadd.f32 1e-05, %v1157_v47 }
 0x12e   : > { %1663 = vrsqrt.f32 %v1159_v49 }
 0x13b   : > { %v1664_v54 = vpop.eup %1663 }
 0x13c   : > { %v1161_v58 = vmul.f32 %v1664_v54, %v1158_v52 }
 0x13e   : > { %v1163_v61 = vmul.f32 %v1161_v58, %v1152_v39  ;;  %v1169_v63 = vrot.slane %v1161_v58, %v1168_v53 }
 0x140   : > { %v1164_v6 = vsub.f32 %v1162_v60, %v1163_v61  ;;  %v1193_v40 = vmul.f32 %v1522_v1, %v1169_v63  ;;  %v1194_v8 = vmul.f32 %v1523_v4, %v1169_v63  ;;  %v1195_v62 = vmul.f32 %v1526_v0, %v1169_v63 }
 0x141   : > { %v1196_v9 = vmul.f32 %v1527_v2, %v1169_v63  ;;  %v1197_v10 = vmul.f32 %v1530_v48, %v1169_v63  ;;  %v1198_v11 = vmul.f32 %v1531_v7, %v1169_v63  ;;  %v1199_v12 = vmul.f32 %v1534_v5, %v1169_v63 }
 0x142   : > { %v1175_v44 = vrot.slane %v1164_v6, %v1168_v53  ;;  %v1200_v13 = vmul.f32 %v1535_v43, %v1169_v63 }
 0x144   : > { %v1201_v14 = vadd.f32 %v1193_v40, %v1175_v44  ;;  %v1202_v16 = vadd.f32 %v1194_v8, %v1175_v44  ;;  %v1203_v17 = vadd.f32 %v1195_v62, %v1175_v44  ;;  %v1204_v18 = vadd.f32 %v1196_v9, %v1175_v44 }
 0x145   : > { %v1205_v19 = vadd.f32 %v1197_v10, %v1175_v44  ;;  %v1206_v20 = vadd.f32 %v1198_v11, %v1175_v44  ;;  %v1207_v34 = vadd.f32 %v1199_v12, %v1175_v44  ;;  %v1208_v15 = vadd.f32 %v1200_v13, %v1175_v44 }
 0x146   : > { %v1209_v21 = vmax.f32 %v1201_v14, 0.0  ;;  %v1210_v22 = vmax.f32 %v1202_v16, 0.0  ;;  %v1211_v23 = vmax.f32 %v1203_v17, 0.0  ;;  %v1212_v24 = vmax.f32 %v1204_v18, 0.0 }
 0x147   : > { %v1213_v25 = vmax.f32 %v1205_v19, 0.0  ;;  %v1214_v26 = vmax.f32 %v1206_v20, 0.0  ;;  %v1215_v27 = vmax.f32 %v1207_v34, 0.0  ;;  %v1216_v28 = vmax.f32 %v1208_v15, 0.0 }
 0x148   : > { %v1539_v29 = vpack.c.bf16 %v1210_v22, %v1209_v21  ;;  %v1544_v30 = vpack.c.bf16 %v1212_v24, %v1211_v23 }
 0x149   : > { %v1549_v31 = vpack.c.bf16 %v1214_v26, %v1213_v25  ;;  %v1554_v32 = vpack.c.bf16 %v1216_v28, %v1215_v27 }
 0x14a   : > { %1540 = vst [vmem:[%s283_s12] sm:$0xff] %v1539_v29   ;;  %1562 = vst [vmem:[%s283_s12 + $0x8] sm:$0xff] %v1544_v30  }
 0x14b   : > { %1563 = vst [vmem:[%s283_s12 + $0x10] sm:$0xff] %v1549_v31   ;;  %1564 = vst [vmem:[%s283_s12 + $0x18] sm:$0xff] %v1554_v32  }
 0x14c PF: > { %s14_s17 = sadd.s32 1, %s1687_s17   ;;  %s1901_s15 = smov %s1683_s16 }
 0x14d   : > { %p11_p5 = scmp.ge.s32.totalorder %s14_s17, 4   ;;  %s1902_s16 = smov %s1904_s18 }
 0x14f   :  { %13 = sbr.rel (!%p11_p5) target bundleno = 2 (0x2), region = 88 }

</bundles_post_ra>
